<compile_context>
chip_gen: v7x
topology: tpu7x:2x2x1
jax: 0.10.0
libtpu: 0.0.40
codegen_flags: <defaults>
</compile_context>

<pallas_src>
import functools

import jax
import jax.numpy as jnp
from jax import lax
from jax.experimental import pallas as pl
from jax.experimental.pallas import tpu as pltpu


def _mmd_kernel(src_ref, tgt_ref, out_ref, acc_ref, *, B, TR, kernel_mul, kernel_num):
    r = pl.program_id(0)
    nsteps = pl.num_programs(0)
    N = 2 * B

    S = src_ref[...]  # (B, Dp) f32 (feature dim zero-padded to 128-lane multiple)
    T = tgt_ref[...]

    # ---- bandwidth prologue (analytic, O(B*Dp); recomputed per step so the
    # row-tile axis has no cross-step data dependency) ------------------------
    # per-row squared norms as lane-major (1, B) rows for column broadcasting
    cn_s = jnp.sum(S * S, axis=1, keepdims=True).T            # (1, B)
    cn_t = jnp.sum(T * T, axis=1, keepdims=True).T            # (1, B)
    total_sq = jnp.sum(cn_s) + jnp.sum(cn_t)
    col_sum = jnp.sum(S, axis=0, keepdims=True) + jnp.sum(T, axis=0, keepdims=True)
    sum_l2 = 2.0 * float(N) * total_sq - 2.0 * jnp.sum(col_sum * col_sum)
    bandwidth = sum_l2 / float(N * N - N)
    bw0 = bandwidth / (kernel_mul ** (kernel_num // 2))
    neg_inv_bw0 = -1.0 / bw0          # single scalar divide for the whole kernel

    def gauss_block_sum(l2):
        # clamp tiny negatives from Gram-form cancellation (diag -> exactly 0)
        l2 = jnp.maximum(l2, 0.0)
        if kernel_mul == 2.0:
            # one exp per element at the LARGEST bandwidth; the remaining
            # bandwidths follow by successive squaring: exp(-l2/(bw/2)) = t*t
            t = jnp.exp(l2 * (neg_inv_bw0 * (0.5 ** (kernel_num - 1))))
            acc = t
            for _ in range(kernel_num - 1):
                t = t * t
                acc = acc + t
        else:
            inv_mul = 1.0 / kernel_mul
            acc = jnp.exp(l2 * neg_inv_bw0)
            for i in range(1, kernel_num):
                acc = acc + jnp.exp(l2 * (neg_inv_bw0 * (inv_mul ** i)))
        return jnp.sum(acc)

    # ---- this step's row tile of the three B x B blocks ---------------------
    i0 = pl.multiple_of(r * TR, TR)
    s_r = src_ref[pl.ds(i0, TR), :]                            # (TR, Dp)
    t_r = tgt_ref[pl.ds(i0, TR), :]
    rn_s = jnp.sum(s_r * s_r, axis=1, keepdims=True)           # (TR, 1)
    rn_t = jnp.sum(t_r * t_r, axis=1, keepdims=True)

    dn = (((1,), (1,)), ((), ()))     # A . B^T : contract the feature dims
    g_ss = lax.dot_general(s_r, S, dn, preferred_element_type=jnp.float32)  # (TR, B)
    g_tt = lax.dot_general(t_r, T, dn, preferred_element_type=jnp.float32)
    g_st = lax.dot_general(s_r, T, dn, preferred_element_type=jnp.float32)

    p_ss = gauss_block_sum(rn_s + cn_s - 2.0 * g_ss)
    p_tt = gauss_block_sum(rn_t + cn_t - 2.0 * g_tt)
    p_st = gauss_block_sum(rn_s + cn_t - 2.0 * g_st)
    partial = p_ss + p_tt - 2.0 * p_st     # sum(K_YX) == sum(K_XY) by symmetry

    @pl.when(r == 0)
    def _init():
        acc_ref[0] = 0.0

    acc_ref[0] += partial

    @pl.when(r == nsteps - 1)
    def _finalize():
        out_ref[0, 0] = acc_ref[0] * (1.0 / float(B * B))


def _pick_row_tile(B):
    """Largest row tile dividing B that keeps a (TR, B) f32 slab <= ~4 MiB."""
    if B <= 512:
        return B
    best = B
    for t in (512, 256, 128, 64, 32, 16, 8):
        if B % t == 0:
            best = t
            if t * B * 4 <= (4 << 20):
                return t
    return best


def mmd_loss(source, target, kernel_mul=2.0, kernel_num=5):
    assert source.ndim == 2 and source.shape == target.shape
    B, D = source.shape
    source = source.astype(jnp.float32)
    target = target.astype(jnp.float32)

    # Zero-pad the feature dim to a lane-aligned multiple of 128.
    Dp = ((D + 127) // 128) * 128
    if Dp != D:
        source = jnp.pad(source, ((0, 0), (0, Dp - D)))
        target = jnp.pad(target, ((0, 0), (0, Dp - D)))

    TR = _pick_row_tile(B)
    grid = (B // TR,)

    kernel = functools.partial(
        _mmd_kernel, B=B, TR=TR,
        kernel_mul=float(kernel_mul), kernel_num=int(kernel_num))

    out = pl.pallas_call(
        kernel,
        out_shape=jax.ShapeDtypeStruct((1, 1), jnp.float32),
        grid=grid,
        in_specs=[
            pl.BlockSpec((B, Dp), lambda r: (0, 0), memory_space=pltpu.MemorySpace.VMEM),
            pl.BlockSpec((B, Dp), lambda r: (0, 0), memory_space=pltpu.MemorySpace.VMEM),
        ],
        out_specs=pl.BlockSpec((1, 1), lambda r: (0, 0),
                               memory_space=pltpu.MemorySpace.SMEM),
        scratch_shapes=[pltpu.SMEM((1,), jnp.float32)],
        compiler_params=pltpu.CompilerParams(
            dimension_semantics=("arbitrary",),
            vmem_limit_bytes=48 * 1024 * 1024,
        ),
    )(source, target)
    return out[0, 0]


def _mmd_loss_ref(source, target, kernel_mul=2.0, kernel_num=5):
    """Pure-JAX reference matching the PyTorch module semantics."""
    B = source.shape[0]
    N = 2 * B
    total = jnp.concatenate([source, target], axis=0)
    diff = total[None, :, :] - total[:, None, :]
    l2 = jnp.sum(diff * diff, axis=2)
    bandwidth = jnp.sum(l2) / (N * N - N)
    bandwidth = bandwidth / (kernel_mul ** (kernel_num // 2))
    kernels = sum(jnp.exp(-l2 / (bandwidth * kernel_mul ** i)) for i in range(kernel_num))
    XX = kernels[:B, :B]
    YY = kernels[B:, B:]
    XY = kernels[:B, B:]
    YX = kernels[B:, :B]
    return jnp.mean(XX + YY - XY - YX)


if __name__ == "__main__":
    key = jax.random.PRNGKey(0)
    k1, k2 = jax.random.split(key)
    B, D = 8, 32
    source = jax.random.normal(k1, (B, D), dtype=jnp.float32)
    target = jax.random.normal(k2, (B, D), dtype=jnp.float32) + 0.5

    loss = jax.block_until_ready(mmd_loss(source, target))
    loss_ref = jax.block_until_ready(_mmd_loss_ref(source, target))

    assert jnp.allclose(loss, loss_ref, rtol=1e-4, atol=2e-5), (loss, loss_ref)
    print("KERNEL_OK")
</pallas_src>

<mosaic_0001>
module attributes {stable_mosaic.version = 11 : i64} {
  func.func @_mmd_kernel(%arg0: i32, %arg1: memref<8x128xf32, #tpu.memory_space<vmem>>, %arg2: memref<8x128xf32, #tpu.memory_space<vmem>>, %arg3: memref<1x1xf32, #tpu.memory_space<smem>>, %arg4: memref<1xf32, #tpu.memory_space<smem>>) attributes {dimension_semantics = [#tpu.dimension_semantics<arbitrary>], iteration_bounds = array<i64: 1>, scalar_prefetch = 0 : i64, scratch_operands = 1 : i64, tpu.core_type = #tpu.core_type<tc>, window_params = [{pipeline_mode = #tpu.pipeline_mode<synchronous>, transform_indices = @transform_0, window_bounds = array<i64: 8, 128>}, {pipeline_mode = #tpu.pipeline_mode<synchronous>, transform_indices = @transform_1, window_bounds = array<i64: 8, 128>}, {transform_indices = @transform_2, window_bounds = array<i64: 1, 1>}]} {
    %c0 = arith.constant 0 : index
    %c0_0 = arith.constant 0 : index
    %0 = vector.load %arg1[%c0, %c0_0] : memref<8x128xf32, #tpu.memory_space<vmem>>, vector<8x128xf32>
    %c0_1 = arith.constant 0 : index
    %c0_2 = arith.constant 0 : index
    %1 = vector.load %arg2[%c0_1, %c0_2] : memref<8x128xf32, #tpu.memory_space<vmem>>, vector<8x128xf32>
    %2 = arith.mulf %0, %0 : vector<8x128xf32>
    %cst = arith.constant dense<0.000000e+00> : vector<8xf32>
    %3 = vector.multi_reduction <add>, %2, %cst [1] : vector<8x128xf32> to vector<8xf32>
    %4 = vector.shape_cast %3 : vector<8xf32> to vector<8x1xf32>
    %5 = tpu.transpose %4, [1, 0] : vector<8x1xf32> -> vector<1x8xf32>
    %6 = arith.mulf %1, %1 : vector<8x128xf32>
    %cst_3 = arith.constant dense<0.000000e+00> : vector<8xf32>
    %7 = vector.multi_reduction <add>, %6, %cst_3 [1] : vector<8x128xf32> to vector<8xf32>
    %8 = vector.shape_cast %7 : vector<8xf32> to vector<8x1xf32>
    %9 = tpu.transpose %8, [1, 0] : vector<8x1xf32> -> vector<1x8xf32>
    %10 = vector.shape_cast %5 : vector<1x8xf32> to vector<1x1x8xf32>
    %cst_4 = arith.constant dense<0.000000e+00> : vector<1xf32>
    %11 = vector.multi_reduction <add>, %10, %cst_4 [1, 2] : vector<1x1x8xf32> to vector<1xf32>
    %12 = vector.shape_cast %11 : vector<1xf32> to vector<1x1x1xf32>
    %13 = vector.extract %12[0, 0, 0] : f32 from vector<1x1x1xf32>
    %14 = vector.shape_cast %9 : vector<1x8xf32> to vector<1x1x8xf32>
    %cst_5 = arith.constant dense<0.000000e+00> : vector<1xf32>
    %15 = vector.multi_reduction <add>, %14, %cst_5 [1, 2] : vector<1x1x8xf32> to vector<1xf32>
    %16 = vector.shape_cast %15 : vector<1xf32> to vector<1x1x1xf32>
    %17 = vector.extract %16[0, 0, 0] : f32 from vector<1x1x1xf32>
    %18 = arith.addf %13, %17 : f32
    %cst_6 = arith.constant dense<0.000000e+00> : vector<128xf32>
    %19 = vector.multi_reduction <add>, %0, %cst_6 [0] : vector<8x128xf32> to vector<128xf32>
    %20 = vector.shape_cast %19 : vector<128xf32> to vector<1x128xf32>
    %cst_7 = arith.constant dense<0.000000e+00> : vector<128xf32>
    %21 = vector.multi_reduction <add>, %1, %cst_7 [0] : vector<8x128xf32> to vector<128xf32>
    %22 = vector.shape_cast %21 : vector<128xf32> to vector<1x128xf32>
    %23 = arith.addf %20, %22 : vector<1x128xf32>
    %cst_8 = arith.constant 3.200000e+01 : f32
    %24 = arith.mulf %cst_8, %18 : f32
    %25 = arith.mulf %23, %23 : vector<1x128xf32>
    %26 = vector.shape_cast %25 : vector<1x128xf32> to vector<1x1x128xf32>
    %cst_9 = arith.constant dense<0.000000e+00> : vector<1xf32>
    %27 = vector.multi_reduction <add>, %26, %cst_9 [1, 2] : vector<1x1x128xf32> to vector<1xf32>
    %28 = vector.shape_cast %27 : vector<1xf32> to vector<1x1x1xf32>
    %29 = vector.extract %28[0, 0, 0] : f32 from vector<1x1x1xf32>
    %cst_10 = arith.constant 2.000000e+00 : f32
    %30 = arith.mulf %cst_10, %29 : f32
    %31 = arith.subf %24, %30 : f32
    %cst_11 = arith.constant 2.400000e+02 : f32
    %32 = arith.divf %31, %cst_11 : f32
    %cst_12 = arith.constant 4.000000e+00 : f32
    %33 = arith.divf %32, %cst_12 : f32
    %cst_13 = arith.constant -1.000000e+00 : f32
    %34 = arith.divf %cst_13, %33 : f32
    %c8_i32 = arith.constant 8 : i32
    %35 = arith.muli %arg0, %c8_i32 : i32
    %36 = tpu.assume_multiple %35, 8 : i32
    %37 = arith.index_cast %36 : i32 to index
    %c0_14 = arith.constant 0 : index
    %38 = vector.load %arg1[%37, %c0_14] : memref<8x128xf32, #tpu.memory_space<vmem>>, vector<8x128xf32>
    %39 = arith.index_cast %36 : i32 to index
    %c0_15 = arith.constant 0 : index
    %40 = vector.load %arg2[%39, %c0_15] : memref<8x128xf32, #tpu.memory_space<vmem>>, vector<8x128xf32>
    %41 = arith.mulf %38, %38 : vector<8x128xf32>
    %cst_16 = arith.constant dense<0.000000e+00> : vector<8xf32>
    %42 = vector.multi_reduction <add>, %41, %cst_16 [1] : vector<8x128xf32> to vector<8xf32>
    %43 = vector.shape_cast %42 : vector<8xf32> to vector<8x1xf32>
    %44 = arith.mulf %40, %40 : vector<8x128xf32>
    %cst_17 = arith.constant dense<0.000000e+00> : vector<8xf32>
    %45 = vector.multi_reduction <add>, %44, %cst_17 [1] : vector<8x128xf32> to vector<8xf32>
    %46 = vector.shape_cast %45 : vector<8xf32> to vector<8x1xf32>
    %cst_18 = arith.constant dense<0.000000e+00> : vector<8x8xf32>
    %47 = tpu.matmul %38, %0, %cst_18 {dimension_numbers = #tpu.dot_dimension_numbers<[1], [1], [0], [0], [0, 0, 1, 0], [], []>} : vector<8x128xf32>, vector<8x128xf32>, vector<8x8xf32> -> vector<8x8xf32>
    %cst_19 = arith.constant dense<0.000000e+00> : vector<8x8xf32>
    %48 = tpu.matmul %40, %1, %cst_19 {dimension_numbers = #tpu.dot_dimension_numbers<[1], [1], [0], [0], [0, 0, 1, 0], [], []>} : vector<8x128xf32>, vector<8x128xf32>, vector<8x8xf32> -> vector<8x8xf32>
    %cst_20 = arith.constant dense<0.000000e+00> : vector<8x8xf32>
    %49 = tpu.matmul %38, %1, %cst_20 {dimension_numbers = #tpu.dot_dimension_numbers<[1], [1], [0], [0], [0, 0, 1, 0], [], []>} : vector<8x128xf32>, vector<8x128xf32>, vector<8x8xf32> -> vector<8x8xf32>
    %50 = vector.broadcast %43 : vector<8x1xf32> to vector<8x8xf32>
    %51 = vector.broadcast %5 : vector<1x8xf32> to vector<8x8xf32>
    %52 = arith.addf %50, %51 : vector<8x8xf32>
    %cst_21 = arith.constant 2.000000e+00 : f32
    %53 = vector.broadcast %cst_21 : f32 to vector<8x8xf32>
    %54 = arith.mulf %53, %47 : vector<8x8xf32>
    %55 = arith.subf %52, %54 : vector<8x8xf32>
    %cst_22 = arith.constant 0.000000e+00 : f32
    %56 = vector.broadcast %cst_22 : f32 to vector<8x8xf32>
    %57 = arith.maximumf %55, %56 : vector<8x8xf32>
    %cst_23 = arith.constant 6.250000e-02 : f32
    %58 = arith.mulf %34, %cst_23 : f32
    %59 = vector.broadcast %58 : f32 to vector<8x8xf32>
    %60 = arith.mulf %57, %59 : vector<8x8xf32>
    %61 = math.exp %60 : vector<8x8xf32>
    %62 = arith.mulf %61, %61 : vector<8x8xf32>
    %63 = arith.addf %61, %62 : vector<8x8xf32>
    %64 = arith.mulf %62, %62 : vector<8x8xf32>
    %65 = arith.addf %63, %64 : vector<8x8xf32>
    %66 = arith.mulf %64, %64 : vector<8x8xf32>
    %67 = arith.addf %65, %66 : vector<8x8xf32>
    %68 = arith.mulf %66, %66 : vector<8x8xf32>
    %69 = arith.addf %67, %68 : vector<8x8xf32>
    %70 = vector.shape_cast %69 : vector<8x8xf32> to vector<1x8x8xf32>
    %cst_24 = arith.constant dense<0.000000e+00> : vector<1xf32>
    %71 = vector.multi_reduction <add>, %70, %cst_24 [1, 2] : vector<1x8x8xf32> to vector<1xf32>
    %72 = vector.shape_cast %71 : vector<1xf32> to vector<1x1x1xf32>
    %73 = vector.extract %72[0, 0, 0] : f32 from vector<1x1x1xf32>
    %74 = vector.broadcast %46 : vector<8x1xf32> to vector<8x8xf32>
    %75 = vector.broadcast %9 : vector<1x8xf32> to vector<8x8xf32>
    %76 = arith.addf %74, %75 : vector<8x8xf32>
    %cst_25 = arith.constant 2.000000e+00 : f32
    %77 = vector.broadcast %cst_25 : f32 to vector<8x8xf32>
    %78 = arith.mulf %77, %48 : vector<8x8xf32>
    %79 = arith.subf %76, %78 : vector<8x8xf32>
    %cst_26 = arith.constant 0.000000e+00 : f32
    %80 = vector.broadcast %cst_26 : f32 to vector<8x8xf32>
    %81 = arith.maximumf %79, %80 : vector<8x8xf32>
    %cst_27 = arith.constant 6.250000e-02 : f32
    %82 = arith.mulf %34, %cst_27 : f32
    %83 = vector.broadcast %82 : f32 to vector<8x8xf32>
    %84 = arith.mulf %81, %83 : vector<8x8xf32>
    %85 = math.exp %84 : vector<8x8xf32>
    %86 = arith.mulf %85, %85 : vector<8x8xf32>
    %87 = arith.addf %85, %86 : vector<8x8xf32>
    %88 = arith.mulf %86, %86 : vector<8x8xf32>
    %89 = arith.addf %87, %88 : vector<8x8xf32>
    %90 = arith.mulf %88, %88 : vector<8x8xf32>
    %91 = arith.addf %89, %90 : vector<8x8xf32>
    %92 = arith.mulf %90, %90 : vector<8x8xf32>
    %93 = arith.addf %91, %92 : vector<8x8xf32>
    %94 = vector.shape_cast %93 : vector<8x8xf32> to vector<1x8x8xf32>
    %cst_28 = arith.constant dense<0.000000e+00> : vector<1xf32>
    %95 = vector.multi_reduction <add>, %94, %cst_28 [1, 2] : vector<1x8x8xf32> to vector<1xf32>
    %96 = vector.shape_cast %95 : vector<1xf32> to vector<1x1x1xf32>
    %97 = vector.extract %96[0, 0, 0] : f32 from vector<1x1x1xf32>
    %98 = vector.broadcast %43 : vector<8x1xf32> to vector<8x8xf32>
    %99 = vector.broadcast %9 : vector<1x8xf32> to vector<8x8xf32>
    %100 = arith.addf %98, %99 : vector<8x8xf32>
    %cst_29 = arith.constant 2.000000e+00 : f32
    %101 = vector.broadcast %cst_29 : f32 to vector<8x8xf32>
    %102 = arith.mulf %101, %49 : vector<8x8xf32>
    %103 = arith.subf %100, %102 : vector<8x8xf32>
    %cst_30 = arith.constant 0.000000e+00 : f32
    %104 = vector.broadcast %cst_30 : f32 to vector<8x8xf32>
    %105 = arith.maximumf %103, %104 : vector<8x8xf32>
    %cst_31 = arith.constant 6.250000e-02 : f32
    %106 = arith.mulf %34, %cst_31 : f32
    %107 = vector.broadcast %106 : f32 to vector<8x8xf32>
    %108 = arith.mulf %105, %107 : vector<8x8xf32>
    %109 = math.exp %108 : vector<8x8xf32>
    %110 = arith.mulf %109, %109 : vector<8x8xf32>
    %111 = arith.addf %109, %110 : vector<8x8xf32>
    %112 = arith.mulf %110, %110 : vector<8x8xf32>
    %113 = arith.addf %111, %112 : vector<8x8xf32>
    %114 = arith.mulf %112, %112 : vector<8x8xf32>
    %115 = arith.addf %113, %114 : vector<8x8xf32>
    %116 = arith.mulf %114, %114 : vector<8x8xf32>
    %117 = arith.addf %115, %116 : vector<8x8xf32>
    %118 = vector.shape_cast %117 : vector<8x8xf32> to vector<1x8x8xf32>
    %cst_32 = arith.constant dense<0.000000e+00> : vector<1xf32>
    %119 = vector.multi_reduction <add>, %118, %cst_32 [1, 2] : vector<1x8x8xf32> to vector<1xf32>
    %120 = vector.shape_cast %119 : vector<1xf32> to vector<1x1x1xf32>
    %121 = vector.extract %120[0, 0, 0] : f32 from vector<1x1x1xf32>
    %122 = arith.addf %73, %97 : f32
    %cst_33 = arith.constant 2.000000e+00 : f32
    %123 = arith.mulf %cst_33, %121 : f32
    %124 = arith.subf %122, %123 : f32
    %c0_i32 = arith.constant 0 : i32
    %125 = arith.cmpi eq, %arg0, %c0_i32 : i32
    %126 = arith.extui %125 : i1 to i32
    %c0_i32_34 = arith.constant 0 : i32
    %127 = arith.cmpi ne, %126, %c0_i32_34 : i32
    scf.if %127 {
      %cst_39 = arith.constant 0.000000e+00 : f32
      %c0_40 = arith.constant 0 : index
      %134 = memref.load %arg4[%c0_40] : memref<1xf32, #tpu.memory_space<smem>>
      memref.store %cst_39, %arg4[%c0_40] : memref<1xf32, #tpu.memory_space<smem>>
    } else {
    }
    %c0_35 = arith.constant 0 : index
    %128 = memref.load %arg4[%c0_35] : memref<1xf32, #tpu.memory_space<smem>>
    %129 = arith.addf %128, %124 : f32
    %c0_36 = arith.constant 0 : index
    %130 = memref.load %arg4[%c0_36] : memref<1xf32, #tpu.memory_space<smem>>
    memref.store %129, %arg4[%c0_36] : memref<1xf32, #tpu.memory_space<smem>>
    %c0_i32_37 = arith.constant 0 : i32
    %131 = arith.cmpi eq, %arg0, %c0_i32_37 : i32
    %132 = arith.extui %131 : i1 to i32
    %c0_i32_38 = arith.constant 0 : i32
    %133 = arith.cmpi ne, %132, %c0_i32_38 : i32
    scf.if %133 {
      %c0_39 = arith.constant 0 : index
      %134 = memref.load %arg4[%c0_39] : memref<1xf32, #tpu.memory_space<smem>>
      %cst_40 = arith.constant 1.562500e-02 : f32
      %135 = arith.mulf %134, %cst_40 : f32
      %c0_41 = arith.constant 0 : index
      %c0_42 = arith.constant 0 : index
      %136 = memref.load %arg3[%c0_41, %c0_42] : memref<1x1xf32, #tpu.memory_space<smem>>
      memref.store %135, %arg3[%c0_41, %c0_42] : memref<1x1xf32, #tpu.memory_space<smem>>
    } else {
    }
    return
  }
  func.func @transform_0(%arg0: i32) -> (i32, i32) {
    %c0_i32 = arith.constant 0 : i32
    %c0_i32_0 = arith.constant 0 : i32
    %c0_i32_1 = arith.constant 0 : i32
    return %c0_i32, %c0_i32_0 : i32, i32
  }
  func.func @transform_1(%arg0: i32) -> (i32, i32) {
    %c0_i32 = arith.constant 0 : i32
    %c0_i32_0 = arith.constant 0 : i32
    %c0_i32_1 = arith.constant 0 : i32
    return %c0_i32, %c0_i32_0 : i32, i32
  }
  func.func @transform_2(%arg0: i32) -> (i32, i32) {
    %c0_i32 = arith.constant 0 : i32
    %c0_i32_0 = arith.constant 0 : i32
    %c0_i32_1 = arith.constant 0 : i32
    return %c0_i32, %c0_i32_0 : i32, i32
  }
}

</mosaic_0001>

<bundles_post_ra>
// kernel: tpu_custom_call.1
= control target key start
LH: loop header
LB: loop body
LE: loop exit
PB: predicated region body
PF: predicated region fallthrough
CT: control target
= control target key end

     0   :  { %7 = vsyncpa [#allocation4], 0  ;;  %s674_s0 = inlined_call_operand.hbm [shape: f32[8,128], index: 0, kind: input, shape index: {}]   ;;  %s675_s1 = inlined_call_operand.hbm [shape: f32[8,128], index: 1, kind: input, shape index: {}]   ;;  %s676_s2 = inlined_call_operand.hbm [shape: f32[1,1], index: 2, kind: output, shape index: {}]  }
   0x1   :  { %8 = vsyncpa [#allocation7], 0 }
   0x2   :  { %9 = vsyncpa [#allocation5], 0  ;;  %s618_s9 = smov [#allocation3]   ;;  %s619_s11 = smov [#allocation6]  }
   0x3   :  { %s16_s10 = sshll.u32 %s618_s9, 4  ;;  %s26_s12 = sshll.u32 %s619_s11, 4  ;;  %s17_s10 = int_to_ptr.vmem [resolvable:$true] %s16_s10  ;;  %s27_s12 = int_to_ptr.vmem [resolvable:$true] %s26_s12 }
   0x4   :  { %s558_s15 = scalar_lea.hbm %s674_s0, 128 }
   0x5   :  { %p559_p0 = scmp.ne.s32.totalorder %s674_s0, %s558_s15  ;;  %p562_p1 = scmp.lt.u32.totalorder %s558_s15, %s674_s0 }
   0x7   :  { %p564_p2 = pnand %p562_p1, %p559_p0 }
   0x9   :  { %567 = shalt.err (!%p564_p2)
}
   0xa   :  { %s568_s20 = scalar_lea.vmem %s17_s10, 128  ;;  %p573_p4 = scmp.lt.s32.totalorder %s17_s10, %s17_s10 }
   0xb   :  { %p569_p3 = scmp.ne.s32.totalorder %s17_s10, %s568_s20  ;;  %p574_p5 = scmp.lt.s32.totalorder %s568_s20, %s568_s20 }
   0xd   :  { %p575_p6 = por %p574_p5, %p573_p4 }
   0xf   :  { %p576_p7 = pnand %p575_p6, %p569_p3 }
  0x11   :  { %579 = shalt.err (!%p576_p7)
}
  0x12   :  { %19 = dma.hbm_to_vmem [thread:$0]  %s674_s0, 128, %s17_s10, [#allocation4]  }
  0x13   :  { %s580_s25 = scalar_lea.hbm %s675_s1, 128 }
  0x14   :  { %p581_p8 = scmp.ne.s32.totalorder %s675_s1, %s580_s25  ;;  %p584_p9 = scmp.lt.u32.totalorder %s580_s25, %s675_s1 }
  0x16   :  { %p586_p10 = pnand %p584_p9, %p581_p8 }
  0x18   :  { %589 = shalt.err (!%p586_p10)
}
  0x19   :  { %s590_s30 = scalar_lea.vmem %s27_s12, 128  ;;  %p595_p12 = scmp.lt.s32.totalorder %s27_s12, %s27_s12 }
  0x1a   :  { %p591_p11 = scmp.ne.s32.totalorder %s27_s12, %s590_s30  ;;  %p596_p13 = scmp.lt.s32.totalorder %s590_s30, %s590_s30 }
  0x1c   :  { %p597_p0 = por %p596_p13, %p595_p12 }
  0x1e   :  { %p598_p1 = pnand %p597_p0, %p591_p11 }
  0x20   :  { %601 = shalt.err (!%p598_p1)
}
  0x21   :  { %29 = dma.hbm_to_vmem [thread:$0]  %s675_s1, 128, %s27_s12, [#allocation7]  }
  0x22   :  { %612 = dma.done.wait [#allocation4], 128  }
  0x23   :  { %613 = vsyncadd [#allocation4], 4294967168 }
  0x24   :  { %614 = dma.done.wait [#allocation7], 128  }
  0x25   :  { %615 = vsyncadd [#allocation7], 4294967168  ;;  %v36_v0 = vld [vmem:[#allocation3] sm:$0xff]  ;;  %v37_v1 = vld [vmem:[#allocation6] sm:$0xff]  ;;  %v620_v4 = vmov 0.0   ;;  %vm621_vm0 = vmmov 0   ;;  %v389_v32 = vlaneseq }
  0x26   :  { %v38_v2 = vmul.f32 %v36_v0, %v36_v0  ;;  %v73_v3 = vmul.f32 %v37_v1, %v37_v1  ;;  %516 = vmatprep.subr.mxu0 %v620_v4  ;;  %518 = vmatprep.mubr.msk.f32.mxu0 %vm621_vm0, %v620_v4  ;;  %v130_v7 = vrot.slane %v36_v0, 4  ;;  %v136_v8 = vrot.slane %v37_v1, 4  ;;  %s602_s24 = scalar_lea.hbm %s676_s2, 16 }
  0x27   :  { %517 = vmatpush3.xpose.msra.mxu0 %v36_v0  ;;  %521 = vmatprep.subr.mxu1 %v620_v4  ;;  %vm108_vm1 = vcmask 57344   ;;  %vm145_vm2 = vcmask 1040384   ;;  %v390_v33 = vshrl.u32 %v389_v32, 7  ;;  %vm410_vm3 = vcmask 64512   ;;  %p603_p2 = scmp.ne.s32.totalorder %s676_s2, %s602_s24  ;;  %p606_p3 = scmp.lt.u32.totalorder %s602_s24, %s676_s2 }
  0x28   :  { %39 = vadd.xlane.f32.xlu0 %v38_v2  ;;  %526 = vmatprep.subr.mxu0 %v620_v4  ;;  %v131_v9 = vadd.f32 %v130_v7, %v36_v0  ;;  %v137_v10 = vadd.f32 %v136_v8, %v37_v1 }
  0x29   :  { %522 = vmatpush3.xpose.msra.mxu1 %v37_v1  ;;  %523 = vmatprep.mubr.msk.f32.mxu1 %vm621_vm0, %v620_v4  ;;  %v391_v36 = vsub.s32 0, %v390_v33  ;;  %p608_p4 = pnand %p606_p3, %p603_p2 }
  0x2a   :  { %519 = vmatmul.mubr.f32.vlgmr.msra.gmra.mrb[0].mxu0 %v36_v0  ;;  %v132_v11 = vrot.slane %v131_v9, 2  ;;  %v138_v12 = vrot.slane %v137_v10, 2 }
  0x2b   :  { %527 = vmatpush3.xpose.msra.mxu0 %v37_v1  ;;  %528 = vmatprep.mubr.msk.f32.mxu0 %vm621_vm0, %v620_v4 }
  0x2c   :  { %74 = vadd.xlane.f32.xlu0 %v73_v3  ;;  %524 = vmatmul.mubr.f32.vlgmr.msra.gmra.mrb[0].mxu1 %v37_v1  ;;  %v133_v13 = vadd.f32 %v132_v11, %v131_v9  ;;  %v139_v14 = vadd.f32 %v138_v12, %v137_v10 }
  0x2e   :  { %529 = vmatmul.mubr.f32.vlgmr.msra.gmra.mrb[2].mxu0 %v36_v0  ;;  %v134_v15 = vrot.slane %v133_v13, 1  ;;  %v140_v16 = vrot.slane %v139_v14, 1 }
  0x30   :  { %v135_v17 = vadd.f32 %v134_v15, %v133_v13  ;;  %v141_v18 = vadd.f32 %v140_v16, %v139_v14 }
  0x32   :  { %v142_v19 = vadd.f32 %v141_v18, %v135_v17 }
  0x34   :  { %v144_v20 = vmul.f32 %v142_v19, %v142_v19 }
  0x36   :  { %v146_v23 = vsel %vm145_vm2, %v144_v20, 0.0 }
  0xb5   :  { %v40_v5 = vpop.xlane.xlu0 %39 }
  0xb6   :  { %41 = vxpose.xlu1.b32.start.end [1/1] (short) (narrow) %v40_v5, 8 }
  0xb9   :  { %v75_v6 = vpop.xlane.xlu0 %74 }
  0xba   :  { %76 = vxpose.xlu1.b32.start.end [1/1] (short) (narrow) %v75_v6, 8 }
  0xfd   :  { %v245_v26 = vpop.f32.mrb[0].mxu0 }
  0xfe   :  { %v520_v27 = vpop.f32.mrb[1].mxu0  ;;  %v394_v46 = vmul.f32 2.0, %v245_v26 }
  0xff   :  { %v315_v30 = vpop.f32.mrb[0].mxu1 }
 0x100   :  { %v525_v31 = vpop.f32.mrb[1].mxu1 }
 0x101   :  { %v385_v28 = vpop.f32.mrb[2].mxu0 }
 0x102   :  { %v530_v29 = vpop.f32.mrb[3].mxu0  ;;  %v451_v1 = vmul.f32 2.0, %v385_v28 }
 0x136   :  { %v57_v21 = vpop.trf.xlu1 }
 0x137   :  { %v109_v22 = vsel %vm108_vm1, %v57_v21, 0.0  ;;  %v392_v43 = vrot.slane %v57_v21, %v391_v36 }
 0x138   :  { %110 = vadd.xlane.f32.xlu0 %v109_v22 }
 0x13a   :  { %v92_v24 = vpop.trf.xlu1 }
 0x13b   :  { %v119_v25 = vsel %vm108_vm1, %v92_v24, 0.0  ;;  %v424_v0 = vrot.slane %v92_v24, %v391_v36 }
 0x13c   :  { %147 = vadd.xlane.f32.xlu0 %v146_v23  ;;  %120 = vadd.xlane.f32.xlu1 %v119_v25 }
 0x140   :  { %174 = vadd.xlane.f32.xlu0 %v38_v2 }
 0x144   :  { %177 = vadd.xlane.f32.xlu0 %v73_v3  ;;  %v426_v3 = vmul.f32 2.0, %v315_v30 }
 0x1c5   :  { %v111_v34 = vpop.xlane.xlu0 %110 }
 0x1c6   :  { %v112_v35 = vrot.slane %v111_v34, 4 }
 0x1c8   :  { %v113_v37 = vadd.f32 %v112_v35, %v111_v34 }
 0x1c9   :  { %v148_v38 = vpop.xlane.xlu0 %147  ;;  %v121_v39 = vpop.xlane.xlu1 %120 }
 0x1ca   :  { %v114_v40 = vrot.slane %v113_v37, 2  ;;  %v149_v41 = vrot.slane %v148_v38, 4  ;;  %v122_v42 = vrot.slane %v121_v39, 4 }
 0x1cc   :  { %v150_v44 = vadd.f32 %v149_v41, %v148_v38  ;;  %v123_v45 = vadd.f32 %v122_v42, %v121_v39  ;;  %v115_v47 = vadd.f32 %v114_v40, %v113_v37 }
 0x1cd   :  { %v175_v48 = vpop.xlane.xlu0 %174 }
 0x1ce   :  { %v151_v49 = vrot.slane %v150_v44, 2  ;;  %v124_v50 = vrot.slane %v123_v45, 2  ;;  %v393_v51 = vadd.f32 %v392_v43, %v175_v48  ;;  %v116_v52 = vrot.slane %v115_v47, 1 }
 0x1cf   :  { %v450_v2 = vadd.f32 %v424_v0, %v175_v48 }
 0x1d0   :  { %v125_v53 = vadd.f32 %v124_v50, %v123_v45  ;;  %v395_v54 = vsub.f32 %v393_v51, %v394_v46  ;;  %v152_v55 = vadd.f32 %v151_v49, %v150_v44  ;;  %v117_v56 = vadd.f32 %v116_v52, %v115_v47 }
 0x1d1   :  { %v178_v63 = vpop.xlane.xlu0 %177  ;;  %v452_v5 = vsub.f32 %v450_v2, %v451_v1 }
 0x1d2   :  { %v126_v57 = vrot.slane %v125_v53, 1  ;;  %531 = vpush %v117_v56  ;;  %v153_v58 = vrot.slane %v152_v55, 1  ;;  %v425_v4 = vadd.f32 %v424_v0, %v178_v63  ;;  %v396_v7 = vmax.f32 %v395_v54, 0.0 }
 0x1d3   :  { %v453_v8 = vmax.f32 %v452_v5, 0.0 }
 0x1d4   :  { %v127_v59 = vadd.f32 %v126_v57, %v125_v53  ;;  %v154_v60 = vadd.f32 %v153_v58, %v152_v55  ;;  %v427_v6 = vsub.f32 %v425_v4, %v426_v3 }
 0x1d6   :  { %533 = vpush %v127_v59  ;;  %v428_v9 = vmax.f32 %v427_v6, 0.0 }
 0x1d7   :  { %535 = vpush %v154_v60 }
 0x203   :  { %s532_s1 = spop %531 }
 0x207   :  { %s534_s4 = spop %533 }
 0x208   :  { %s129_s5 = sadd.f32 %s534_s4, %s532_s1  ;;  %s536_s6 = spop %535 }
 0x209   :  { %s156_s7 = smul.f32 2.0, %s536_s6 }
 0x20a   :  { %s143_s8 = smul.f32 32.0, %s129_s5 }
 0x20c   :  { %s157_s9 = ssub.f32 %s143_s8, %s156_s7 }
 0x20e   :  { %s160_s10 = smul.f32 0.004166667, %s157_s9 }
 0x210   :  { %s163_s11 = smul.f32 0.25, %s160_s10 }
 0x212   :  { %v164_v61 = vstv %s163_s11 }
 0x213   :  { %550 = vrcp.f32 %v164_v61 }
 0x21d   :  { %v551_v62 = vpop.eup %550 }
 0x21e   :  { %537 = vpush %v551_v62 }
 0x24f   :  { %s538_s12 = spop %537 }
 0x250   :  { %s167_s13 = smul.f32 -1.0, %s538_s12 }
 0x252   :  { %s397_s14 = smul.f32 0.0625, %s167_s13 }
 0x254   :  { %v398_v10 = vstv %s397_s14 }
 0x255   :  { %v399_v11 = vmul.f32 %v398_v10, %v396_v7  ;;  %v429_v12 = vmul.f32 %v428_v9, %v398_v10  ;;  %v454_v13 = vmul.f32 %v453_v8, %v398_v10 }
 0x257   :  { %v400_v14 = vmul.f32 1.442695, %v399_v11  ;;  %v430_v15 = vmul.f32 1.442695, %v429_v12  ;;  %v455_v16 = vmul.f32 1.442695, %v454_v13 }
 0x259   :  { %552 = vpow2.f32 %v400_v14 }
 0x25a   :  { %554 = vpow2.f32 %v430_v15 }
 0x25b   :  { %556 = vpow2.f32 %v455_v16 }
 0x263   :  { %v553_v17 = vpop.eup %552 }
 0x264   :  { %v555_v18 = vpop.eup %554  ;;  %v402_v19 = vmul.f32 %v553_v17, %v553_v17 }
 0x265   :  { %v557_v20 = vpop.eup %556  ;;  %v432_v21 = vmul.f32 %v555_v18, %v555_v18 }
 0x266   :  { %v403_v22 = vadd.f32 %v553_v17, %v402_v19  ;;  %v404_v23 = vmul.f32 %v402_v19, %v402_v19  ;;  %v457_v24 = vmul.f32 %v557_v20, %v557_v20 }
 0x267   :  { %v433_v25 = vadd.f32 %v555_v18, %v432_v21  ;;  %v434_v26 = vmul.f32 %v432_v21, %v432_v21 }
 0x268   :  { %v405_v27 = vadd.f32 %v404_v23, %v403_v22  ;;  %v406_v28 = vmul.f32 %v404_v23, %v404_v23  ;;  %v458_v29 = vadd.f32 %v557_v20, %v457_v24  ;;  %v459_v30 = vmul.f32 %v457_v24, %v457_v24 }
 0x269   :  { %v435_v31 = vadd.f32 %v434_v26, %v433_v25  ;;  %v436_v32 = vmul.f32 %v434_v26, %v434_v26 }
 0x26a   :  { %v407_v33 = vadd.f32 %v406_v28, %v405_v27  ;;  %v408_v34 = vmul.f32 %v406_v28, %v406_v28  ;;  %v460_v35 = vadd.f32 %v459_v30, %v458_v29  ;;  %v461_v36 = vmul.f32 %v459_v30, %v459_v30 }
 0x26b   :  { %v437_v37 = vadd.f32 %v436_v32, %v435_v31  ;;  %v438_v38 = vmul.f32 %v436_v32, %v436_v32 }
 0x26c   :  { %v409_v39 = vadd.f32 %v408_v34, %v407_v33  ;;  %v462_v42 = vadd.f32 %v461_v36, %v460_v35  ;;  %v463_v43 = vmul.f32 %v461_v36, %v461_v36 }
 0x26d   :  { %v439_v41 = vadd.f32 %v438_v38, %v437_v37 }
 0x26e   :  { %v411_v40 = vsel %vm410_vm3, %v409_v39, 0.0  ;;  %v464_v45 = vadd.f32 %v463_v43, %v462_v42 }
 0x26f   :  { %412 = vadd.xlane.f32.xlu0 %v411_v40  ;;  %v440_v44 = vsel %vm410_vm3, %v439_v41, 0.0 }
 0x270   :  { %v465_v46 = vsel %vm410_vm3, %v464_v45, 0.0 }
 0x273   :  { %441 = vadd.xlane.f32.xlu0 %v440_v44 }
 0x277   :  { %466 = vadd.xlane.f32.xlu0 %v465_v46 }
 0x2fc   :  { %v413_v47 = vpop.xlane.xlu0 %412 }
 0x2fd   :  { %v414_v48 = vrot.slane %v413_v47, 4 }
 0x2ff   :  { %v415_v49 = vadd.f32 %v414_v48, %v413_v47 }
 0x300   :  { %v442_v50 = vpop.xlane.xlu0 %441 }
 0x301   :  { %v416_v51 = vrot.slane %v415_v49, 2  ;;  %v443_v52 = vrot.slane %v442_v50, 4 }
 0x303   :  { %v444_v53 = vadd.f32 %v443_v52, %v442_v50  ;;  %v417_v54 = vadd.f32 %v416_v51, %v415_v49 }
 0x304   :  { %v467_v55 = vpop.xlane.xlu0 %466 }
 0x305   :  { %v445_v56 = vrot.slane %v444_v53, 2  ;;  %v468_v57 = vrot.slane %v467_v55, 4  ;;  %v418_v58 = vrot.slane %v417_v54, 1 }
 0x307   :  { %v469_v59 = vadd.f32 %v468_v57, %v467_v55  ;;  %v419_v60 = vadd.f32 %v418_v58, %v417_v54  ;;  %v446_v61 = vadd.f32 %v445_v56, %v444_v53 }
 0x309   :  { %v470_v62 = vrot.slane %v469_v59, 2  ;;  %539 = vpush %v419_v60  ;;  %v447_v63 = vrot.slane %v446_v61, 1 }
 0x30b   :  { %v471_v0 = vadd.f32 %v470_v62, %v469_v59  ;;  %v448_v1 = vadd.f32 %v447_v63, %v446_v61 }
 0x30d   :  { %541 = vpush %v448_v1  ;;  %v472_v2 = vrot.slane %v471_v0, 1 }
 0x30f   :  { %v473_v3 = vadd.f32 %v472_v2, %v471_v0 }
 0x311   :  { %543 = vpush %v473_v3 }
 0x33a   :  { %s540_s15 = spop %539 }
 0x33e   :  { %s542_s16 = spop %541 }
 0x33f   :  { %s475_s18 = sadd.f32 %s542_s16, %s540_s15 }
 0x342   :  { %s544_s17 = spop %543 }
 0x343   :  { %s476_s19 = smul.f32 2.0, %s544_s17 }
 0x345   :  { %s477_s20 = ssub.f32 %s475_s18, %s476_s19 }
 0x347   :  { %s492_s21 = smul.f32 0.015625, %s477_s20 }
 0x349   :  { %494 = sst [smem:[#allocation8]] %s492_s21 }
 0x34a   :  { %611 = shalt.err (!%p608_p4)
}
 0x34b   :  { %s622_s29 = smov [#allocation8]  }
 0x34c   :  { %502 = dma.smem_to_hbm %s622_s29, 16, %s676_s2, [#allocation5]  }
 0x34d   :  { %616 = dma.done.wait [#allocation5], 16  }
 0x34e   :  { %617 = vsyncadd [#allocation5], 4294967280 }
 0x34f   :  { %506 = sfence }
 0x350   :  { %507 = vsyncpa [#allocation4], 1 }
 0x351   :  { %508 = vsyncpa [#allocation7], 1 }
 0x352   :  { %509 = vsyncpa [#allocation5], 1 }

</bundles_post_ra>
